<compile_context>
chip_gen: v6e
topology: v6e:2x2x1
jax: 0.10.0
libtpu: 0.0.40
codegen_flags: <defaults>
</compile_context>

<pallas_src>
import jax
import jax.numpy as jnp
from jax.experimental import pallas as pl
from jax.experimental.pallas import tpu as pltpu


def _round_up(x, m):
    return ((x + m - 1) // m) * m


def _vmem_capacity_bytes(default=64 * 1024 * 1024):
    """Per-generation VMEM capacity (v7x guard); safe fallback if unavailable."""
    try:
        cap = int(pltpu.get_tpu_info().vmem_capacity_bytes)
        if cap > 0:
            return cap
    except Exception:
        pass
    return default


def _make_tconv_kernel(k, wp, lo_pad):
    """Conv taps via static lane-offset slices + aug-scaled soft-threshold."""
    shifts = [dy * wp + dx for dy in range(k) for dx in range(k)]

    def kernel(x_ref, w_ref, thr_ref, o_ref):
        # x_ref   : (Cin, Lt_pad)    compute dtype, flattened haloed row tile
        # w_ref   : (K*K, Cout, Cin) compute dtype, tap-major weights
        # thr_ref : (Cout, 1)        f32, = theta * aug (precomputed)
        # o_ref   : (Cout, Lo_pad)   lane-dense output tile
        x = x_ref[...]
        acc = None
        for t, s in enumerate(shifts):            # static K*K tap loop
            tap = x[:, s:s + lo_pad]              # (Cin, Lo_pad) static slice
            part = jnp.dot(w_ref[t], tap, preferred_element_type=jnp.float32)
            acc = part if acc is None else acc + part
        thr = thr_ref[...]                        # (Cout, 1) -> lane broadcast
        y = jnp.where(acc > thr, acc - thr,
                      jnp.where(acc < -thr, acc + thr, 0.0))
        o_ref[...] = y.astype(o_ref.dtype)

    return kernel


def tconv_block(x_nchw, weight_oikk, theta, aug, *, k,
                compute_dtype=jnp.bfloat16, out_dtype=None,
                min_parallel_steps=4):
    """x: (N,Cin,H,W); weight: (Cout,Cin,k,k); theta: (Cout,); aug: scalar."""
    N, C_in, H, W = x_nchw.shape
    C_out = weight_oikk.shape[0]
    assert weight_oikk.shape == (C_out, C_in, k, k), weight_oikk.shape
    assert k % 2 == 1, "'same' with symmetric padding requires odd kernel size"
    pad = k // 2
    wp = W + 2 * pad                              # padded image width

    # bf16 output only pays off for Cout >= 16 (sublane packing); else f32.
    if out_dtype is None:
        out_dtype = jnp.bfloat16 if C_out >= 16 else jnp.float32

    # ---- VMEM-budget-driven row tile (double-buffered in + out blocks) ----
    in_isz = jnp.dtype(compute_dtype).itemsize
    out_isz = jnp.dtype(out_dtype).itemsize
    vmem_cap = _vmem_capacity_bytes()
    budget = min(vmem_cap // 8, 12 * 1024 * 1024)   # fits v5e/v6e/v7x scoped VMEM
    per_row = 2 * wp * (C_in * in_isz + C_out * out_isz)
    halo = 2 * (2 * pad) * wp * C_in * in_isz
    th = max(1, min(H, (budget - halo) // per_row))
    n_tiles = pl.cdiv(H, th)
    # Guarantee enough parallel grid steps for v7x's two TensorCores.
    if N * n_tiles < min_parallel_steps:
        want = min(H, pl.cdiv(min_parallel_steps, N))
        th = pl.cdiv(H, want)
        n_tiles = pl.cdiv(H, th)

    lo = th * wp                                   # real output length per tile
    lo_pad = _round_up(lo, 128)                    # lane-dense output stores
    s_max = 2 * pad * wp + 2 * pad                 # largest tap offset
    lt_pad = lo_pad + s_max                        # flattened haloed-tile length

    # ---- plain-JAX glue: pad + haloed row tiles (NO K^2 im2col) -----------
    rows_tot = n_tiles * th
    x_pad = jnp.pad(
        x_nchw, ((0, 0), (0, 0), (pad, rows_tot - H + pad), (pad, pad)))
    if n_tiles == 1:
        x_tiles = x_pad[:, None]                   # (N,1,Cin,th+2p,wp), no copy of halo
    else:
        x_tiles = jnp.stack(
            [x_pad[:, :, t * th: t * th + th + 2 * pad, :]
             for t in range(n_tiles)], axis=1)     # (N,n_tiles,Cin,th+2p,wp)
    x_tiles = x_tiles.reshape(N * n_tiles, C_in, (th + 2 * pad) * wp)
    x_tiles = jnp.pad(
        x_tiles, ((0, 0), (0, 0), (0, lt_pad - (th + 2 * pad) * wp))
    ).astype(compute_dtype)

    # Conv2d weight (Cout,Cin,kh,kw) -> (kh*kw, Cout, Cin), tap-major order.
    w_taps = jnp.transpose(weight_oikk, (2, 3, 0, 1)).reshape(
        k * k, C_out, C_in).astype(compute_dtype)
    # Fold the runtime scalar `aug` into the threshold once, outside the kernel.
    thr = (theta.astype(jnp.float32) *
           jnp.asarray(aug, jnp.float32)).reshape(C_out, 1)

    grid = (N * n_tiles,)
    kernel = _make_tconv_kernel(k, wp, lo_pad)
    out = pl.pallas_call(
        kernel,
        out_shape=jax.ShapeDtypeStruct((N * n_tiles, C_out, lo_pad), out_dtype),
        grid=grid,
        in_specs=[
            pl.BlockSpec((None, C_in, lt_pad), lambda i: (i, 0, 0)),
            # Weight / threshold blocks are constant across the grid (never
            # re-DMA'd).  TODO(synk): single-buffer them (pl.Buffered(1)) to
            # save VMEM on v7x for very large Cout; negligible at these sizes.
            pl.BlockSpec((k * k, C_out, C_in), lambda i: (0, 0, 0)),
            pl.BlockSpec((C_out, 1), lambda i: (0, 0)),
        ],
        out_specs=pl.BlockSpec((None, C_out, lo_pad), lambda i: (i, 0, 0)),
        compiler_params=pltpu.CompilerParams(
            dimension_semantics=("parallel",),
            vmem_limit_bytes=int(min(vmem_cap // 2, 32 * 1024 * 1024))),
    )(x_tiles, w_taps, thr)

    # ---- drop lane/col/row padding, back to NCHW ---------------------------
    out = out[:, :, :lo].reshape(N, n_tiles, C_out, th, wp)[..., :W]
    out = jnp.transpose(out, (0, 2, 1, 3, 4)).reshape(N, C_out, n_tiles * th, W)
    return out[:, :, :H, :]


def _tconv_block_ref(x_nchw, weight, theta, aug):
    """Pure-JAX reference (conv + aug-scaled soft-threshold), NCHW."""
    z = jax.lax.conv_general_dilated(
        x_nchw, weight, window_strides=(1, 1), padding="SAME",
        dimension_numbers=("NCHW", "OIHW", "NCHW"))
    thr = (theta * aug).reshape(1, -1, 1, 1)
    return jnp.where(z > thr, z - thr, jnp.where(z < -thr, z + thr, 0.0))


if __name__ == "__main__":
    N, C_in, C_out, H, W, K = 2, 4, 8, 16, 16, 3

    key = jax.random.PRNGKey(0)
    k_x, k_w, k_t = jax.random.split(key, 3)
    x = jax.random.normal(k_x, (N, C_in, H, W), jnp.float32)
    weight = (jax.random.normal(k_w, (C_out, C_in, K, K), jnp.float32)
              / jnp.sqrt(C_in * K * K))
    theta = jnp.abs(jax.random.normal(k_t, (C_out,), jnp.float32)) * 0.1
    aug = jnp.float32(1.5)

    out = tconv_block(x, weight, theta, aug, k=K)
    out = jax.block_until_ready(out)

    ref = _tconv_block_ref(x, weight, theta, aug)
    assert out.shape == (N, C_out, H, W), out.shape
    # bf16 MXU inputs with f32 accumulation -> tolerance looser than pure f32.
    assert jnp.allclose(out, ref, atol=5e-2, rtol=5e-2), \
        float(jnp.max(jnp.abs(out - ref)))
    print("KERNEL_OK")
</pallas_src>

<mosaic_0001>
module attributes {stable_mosaic.version = 11 : i64} {
  func.func @kernel(%arg0: i32, %arg1: memref<1x4x294xbf16, #tpu.memory_space<vmem>>, %arg2: memref<9x8x4xbf16, #tpu.memory_space<vmem>>, %arg3: memref<8x1xf32, #tpu.memory_space<vmem>>, %arg4: memref<1x8x256xf32, #tpu.memory_space<vmem>>) attributes {dimension_semantics = [#tpu.dimension_semantics<parallel>], iteration_bounds = array<i64: 4>, scalar_prefetch = 0 : i64, scratch_operands = 0 : i64, tpu.core_type = #tpu.core_type<tc>, window_params = [{transform_indices = @transform_0, window_bounds = array<i64: 1, 4, 294>}, {pipeline_mode = #tpu.pipeline_mode<synchronous>, transform_indices = @transform_1, window_bounds = array<i64: 9, 8, 4>}, {pipeline_mode = #tpu.pipeline_mode<synchronous>, transform_indices = @transform_2, window_bounds = array<i64: 8, 1>}, {transform_indices = @transform_3, window_bounds = array<i64: 1, 8, 256>}]} {
    %c0 = arith.constant 0 : index
    %c0_0 = arith.constant 0 : index
    %c0_1 = arith.constant 0 : index
    %0 = vector.load %arg1[%c0, %c0_0, %c0_1] : memref<1x4x294xbf16, #tpu.memory_space<vmem>>, vector<1x4x294xbf16>
    %1 = vector.shape_cast %0 : vector<1x4x294xbf16> to vector<4x294xbf16>
    %2 = vector.extract_strided_slice %1 {offsets = [0, 0], sizes = [4, 256], strides = [1, 1]} : vector<4x294xbf16> to vector<4x256xbf16>
    %c0_2 = arith.constant 0 : index
    %c0_3 = arith.constant 0 : index
    %c0_4 = arith.constant 0 : index
    %3 = vector.load %arg2[%c0_2, %c0_3, %c0_4] : memref<9x8x4xbf16, #tpu.memory_space<vmem>>, vector<1x8x4xbf16>
    %4 = vector.shape_cast %3 : vector<1x8x4xbf16> to vector<8x4xbf16>
    %cst = arith.constant dense<0.000000e+00> : vector<8x256xf32>
    %5 = tpu.matmul %4, %2, %cst {dimension_numbers = #tpu.dot_dimension_numbers<[1], [0], [0], [1], [0, 0, 1, 1], [], []>} : vector<8x4xbf16>, vector<4x256xbf16>, vector<8x256xf32> -> vector<8x256xf32>
    %6 = vector.extract_strided_slice %1 {offsets = [0, 1], sizes = [4, 256], strides = [1, 1]} : vector<4x294xbf16> to vector<4x256xbf16>
    %c1 = arith.constant 1 : index
    %c0_5 = arith.constant 0 : index
    %c0_6 = arith.constant 0 : index
    %7 = vector.load %arg2[%c1, %c0_5, %c0_6] : memref<9x8x4xbf16, #tpu.memory_space<vmem>>, vector<1x8x4xbf16>
    %8 = vector.shape_cast %7 : vector<1x8x4xbf16> to vector<8x4xbf16>
    %cst_7 = arith.constant dense<0.000000e+00> : vector<8x256xf32>
    %9 = tpu.matmul %8, %6, %cst_7 {dimension_numbers = #tpu.dot_dimension_numbers<[1], [0], [0], [1], [0, 0, 1, 1], [], []>} : vector<8x4xbf16>, vector<4x256xbf16>, vector<8x256xf32> -> vector<8x256xf32>
    %10 = arith.addf %5, %9 : vector<8x256xf32>
    %11 = vector.extract_strided_slice %1 {offsets = [0, 2], sizes = [4, 256], strides = [1, 1]} : vector<4x294xbf16> to vector<4x256xbf16>
    %c2 = arith.constant 2 : index
    %c0_8 = arith.constant 0 : index
    %c0_9 = arith.constant 0 : index
    %12 = vector.load %arg2[%c2, %c0_8, %c0_9] : memref<9x8x4xbf16, #tpu.memory_space<vmem>>, vector<1x8x4xbf16>
    %13 = vector.shape_cast %12 : vector<1x8x4xbf16> to vector<8x4xbf16>
    %cst_10 = arith.constant dense<0.000000e+00> : vector<8x256xf32>
    %14 = tpu.matmul %13, %11, %cst_10 {dimension_numbers = #tpu.dot_dimension_numbers<[1], [0], [0], [1], [0, 0, 1, 1], [], []>} : vector<8x4xbf16>, vector<4x256xbf16>, vector<8x256xf32> -> vector<8x256xf32>
    %15 = arith.addf %10, %14 : vector<8x256xf32>
    %16 = vector.extract_strided_slice %1 {offsets = [0, 18], sizes = [4, 256], strides = [1, 1]} : vector<4x294xbf16> to vector<4x256xbf16>
    %c3 = arith.constant 3 : index
    %c0_11 = arith.constant 0 : index
    %c0_12 = arith.constant 0 : index
    %17 = vector.load %arg2[%c3, %c0_11, %c0_12] : memref<9x8x4xbf16, #tpu.memory_space<vmem>>, vector<1x8x4xbf16>
    %18 = vector.shape_cast %17 : vector<1x8x4xbf16> to vector<8x4xbf16>
    %cst_13 = arith.constant dense<0.000000e+00> : vector<8x256xf32>
    %19 = tpu.matmul %18, %16, %cst_13 {dimension_numbers = #tpu.dot_dimension_numbers<[1], [0], [0], [1], [0, 0, 1, 1], [], []>} : vector<8x4xbf16>, vector<4x256xbf16>, vector<8x256xf32> -> vector<8x256xf32>
    %20 = arith.addf %15, %19 : vector<8x256xf32>
    %21 = vector.extract_strided_slice %1 {offsets = [0, 19], sizes = [4, 256], strides = [1, 1]} : vector<4x294xbf16> to vector<4x256xbf16>
    %c4 = arith.constant 4 : index
    %c0_14 = arith.constant 0 : index
    %c0_15 = arith.constant 0 : index
    %22 = vector.load %arg2[%c4, %c0_14, %c0_15] : memref<9x8x4xbf16, #tpu.memory_space<vmem>>, vector<1x8x4xbf16>
    %23 = vector.shape_cast %22 : vector<1x8x4xbf16> to vector<8x4xbf16>
    %cst_16 = arith.constant dense<0.000000e+00> : vector<8x256xf32>
    %24 = tpu.matmul %23, %21, %cst_16 {dimension_numbers = #tpu.dot_dimension_numbers<[1], [0], [0], [1], [0, 0, 1, 1], [], []>} : vector<8x4xbf16>, vector<4x256xbf16>, vector<8x256xf32> -> vector<8x256xf32>
    %25 = arith.addf %20, %24 : vector<8x256xf32>
    %26 = vector.extract_strided_slice %1 {offsets = [0, 20], sizes = [4, 256], strides = [1, 1]} : vector<4x294xbf16> to vector<4x256xbf16>
    %c5 = arith.constant 5 : index
    %c0_17 = arith.constant 0 : index
    %c0_18 = arith.constant 0 : index
    %27 = vector.load %arg2[%c5, %c0_17, %c0_18] : memref<9x8x4xbf16, #tpu.memory_space<vmem>>, vector<1x8x4xbf16>
    %28 = vector.shape_cast %27 : vector<1x8x4xbf16> to vector<8x4xbf16>
    %cst_19 = arith.constant dense<0.000000e+00> : vector<8x256xf32>
    %29 = tpu.matmul %28, %26, %cst_19 {dimension_numbers = #tpu.dot_dimension_numbers<[1], [0], [0], [1], [0, 0, 1, 1], [], []>} : vector<8x4xbf16>, vector<4x256xbf16>, vector<8x256xf32> -> vector<8x256xf32>
    %30 = arith.addf %25, %29 : vector<8x256xf32>
    %31 = vector.extract_strided_slice %1 {offsets = [0, 36], sizes = [4, 256], strides = [1, 1]} : vector<4x294xbf16> to vector<4x256xbf16>
    %c6 = arith.constant 6 : index
    %c0_20 = arith.constant 0 : index
    %c0_21 = arith.constant 0 : index
    %32 = vector.load %arg2[%c6, %c0_20, %c0_21] : memref<9x8x4xbf16, #tpu.memory_space<vmem>>, vector<1x8x4xbf16>
    %33 = vector.shape_cast %32 : vector<1x8x4xbf16> to vector<8x4xbf16>
    %cst_22 = arith.constant dense<0.000000e+00> : vector<8x256xf32>
    %34 = tpu.matmul %33, %31, %cst_22 {dimension_numbers = #tpu.dot_dimension_numbers<[1], [0], [0], [1], [0, 0, 1, 1], [], []>} : vector<8x4xbf16>, vector<4x256xbf16>, vector<8x256xf32> -> vector<8x256xf32>
    %35 = arith.addf %30, %34 : vector<8x256xf32>
    %36 = vector.extract_strided_slice %1 {offsets = [0, 37], sizes = [4, 256], strides = [1, 1]} : vector<4x294xbf16> to vector<4x256xbf16>
    %c7 = arith.constant 7 : index
    %c0_23 = arith.constant 0 : index
    %c0_24 = arith.constant 0 : index
    %37 = vector.load %arg2[%c7, %c0_23, %c0_24] : memref<9x8x4xbf16, #tpu.memory_space<vmem>>, vector<1x8x4xbf16>
    %38 = vector.shape_cast %37 : vector<1x8x4xbf16> to vector<8x4xbf16>
    %cst_25 = arith.constant dense<0.000000e+00> : vector<8x256xf32>
    %39 = tpu.matmul %38, %36, %cst_25 {dimension_numbers = #tpu.dot_dimension_numbers<[1], [0], [0], [1], [0, 0, 1, 1], [], []>} : vector<8x4xbf16>, vector<4x256xbf16>, vector<8x256xf32> -> vector<8x256xf32>
    %40 = arith.addf %35, %39 : vector<8x256xf32>
    %41 = vector.extract_strided_slice %1 {offsets = [0, 38], sizes = [4, 256], strides = [1, 1]} : vector<4x294xbf16> to vector<4x256xbf16>
    %c8 = arith.constant 8 : index
    %c0_26 = arith.constant 0 : index
    %c0_27 = arith.constant 0 : index
    %42 = vector.load %arg2[%c8, %c0_26, %c0_27] : memref<9x8x4xbf16, #tpu.memory_space<vmem>>, vector<1x8x4xbf16>
    %43 = vector.shape_cast %42 : vector<1x8x4xbf16> to vector<8x4xbf16>
    %cst_28 = arith.constant dense<0.000000e+00> : vector<8x256xf32>
    %44 = tpu.matmul %43, %41, %cst_28 {dimension_numbers = #tpu.dot_dimension_numbers<[1], [0], [0], [1], [0, 0, 1, 1], [], []>} : vector<8x4xbf16>, vector<4x256xbf16>, vector<8x256xf32> -> vector<8x256xf32>
    %45 = arith.addf %40, %44 : vector<8x256xf32>
    %c0_29 = arith.constant 0 : index
    %c0_30 = arith.constant 0 : index
    %46 = vector.load %arg3[%c0_29, %c0_30] : memref<8x1xf32, #tpu.memory_space<vmem>>, vector<8x1xf32>
    %47 = vector.broadcast %46 : vector<8x1xf32> to vector<8x256xf32>
    %48 = arith.cmpf ogt, %45, %47 : vector<8x256xf32>
    %49 = vector.broadcast %46 : vector<8x1xf32> to vector<8x256xf32>
    %50 = arith.subf %45, %49 : vector<8x256xf32>
    %cst_31 = arith.constant 0.000000e+00 : f32
    %51 = vector.broadcast %cst_31 : f32 to vector<8x1xf32>
    %52 = arith.subf %51, %46 : vector<8x1xf32>
    %53 = vector.broadcast %52 : vector<8x1xf32> to vector<8x256xf32>
    %54 = arith.cmpf olt, %45, %53 : vector<8x256xf32>
    %55 = vector.broadcast %46 : vector<8x1xf32> to vector<8x256xf32>
    %56 = arith.addf %45, %55 : vector<8x256xf32>
    %cst_32 = arith.constant 0.000000e+00 : f32
    %57 = vector.broadcast %cst_32 : f32 to vector<8x256xf32>
    %58 = arith.select %54, %56, %57 : vector<8x256xi1>, vector<8x256xf32>
    %59 = arith.select %48, %50, %58 : vector<8x256xi1>, vector<8x256xf32>
    %c0_33 = arith.constant 0 : index
    %c0_34 = arith.constant 0 : index
    %c0_35 = arith.constant 0 : index
    %60 = vector.load %arg4[%c0_33, %c0_34, %c0_35] : memref<1x8x256xf32, #tpu.memory_space<vmem>>, vector<1x8x256xf32>
    %61 = vector.shape_cast %60 : vector<1x8x256xf32> to vector<8x256xf32>
    %62 = vector.shape_cast %59 : vector<8x256xf32> to vector<1x8x256xf32>
    tpu.vector_store %arg4[%c0_33, %c0_34, %c0_35], %62 {strides = array<i32>} : memref<1x8x256xf32, #tpu.memory_space<vmem>>, vector<1x8x256xf32>,
    return
  }
  func.func @transform_0(%arg0: i32) -> (i32, i32, i32) {
    %c0_i32 = arith.constant 0 : i32
    %c0_i32_0 = arith.constant 0 : i32
    %c0_i32_1 = arith.constant 0 : i32
    return %arg0, %c0_i32, %c0_i32_0 : i32, i32, i32
  }
  func.func @transform_1(%arg0: i32) -> (i32, i32, i32) {
    %c0_i32 = arith.constant 0 : i32
    %c0_i32_0 = arith.constant 0 : i32
    %c0_i32_1 = arith.constant 0 : i32
    %c0_i32_2 = arith.constant 0 : i32
    return %c0_i32, %c0_i32_0, %c0_i32_1 : i32, i32, i32
  }
  func.func @transform_2(%arg0: i32) -> (i32, i32) {
    %c0_i32 = arith.constant 0 : i32
    %c0_i32_0 = arith.constant 0 : i32
    %c0_i32_1 = arith.constant 0 : i32
    return %c0_i32, %c0_i32_0 : i32, i32
  }
  func.func @transform_3(%arg0: i32) -> (i32, i32, i32) {
    %c0_i32 = arith.constant 0 : i32
    %c0_i32_0 = arith.constant 0 : i32
    %c0_i32_1 = arith.constant 0 : i32
    return %arg0, %c0_i32, %c0_i32_0 : i32, i32, i32
  }
}

</mosaic_0001>

<bundles_post_ra>
// kernel: tpu_custom_call.1
= control target key start
LH: loop header
LB: loop body
LE: loop exit
PB: predicated region body
PF: predicated region fallthrough
CT: control target
= control target key end

     0   :  { %8 = vsyncpa [#allocation3], 0  ;;  %s1198_s0 = inlined_call_operand.vmem [shape: bf16[4,4,294], index: 0, kind: input, shape index: {}]   ;;  %s1199_s1 = inlined_call_operand.vmem [shape: bf16[9,8,4], index: 1, kind: input, shape index: {}]   ;;  %s1200_s2 = inlined_call_operand.vmem [shape: f32[8,1], index: 2, kind: input, shape index: {}]   ;;  %s1201_s3 = inlined_call_operand.hbm [shape: f32[4,8,256], index: 3, kind: output, shape index: {}]  }
   0x1   :  { %10 = vsyncpa [#allocation3 + $0x1], 0  ;;  %s1027_s12 = smov 0   ;;  %s1029_s13 = smov 0  }
   0x2   :  { %s1031_s14 = smov 0   ;;  %s1033_s15 = smov 0  }
   0x3 LB: > { %s1048_s16 = sadd.s32 4294967295, %s994_s15   ;;  %s843_s17 = sadd.s32 4294967294, %s994_s15   ;;  %s994_s15 = sphi %s1033_s15, %s1207_s15   ;;  %s990_s14 = sphi %s1031_s14, %s1206_s14   ;;  %s986_s13 = sphi %s1029_s13, %s1205_s13   ;;  %s982_s12 = sphi %s1027_s12, %s1204_s12  }
   0x4   : > { %s1052_s18 = sadd.s32 1, %s994_s15   ;;  %s91_s19 = sadd.s32 1, %s990_s14 }
   0x5   : > { %s88_s20 = ssub.s32 %s994_s15, %s1052_s18  ;;  %p101_p0 = scmp.ne.s32.totalorder %s990_s14, %s986_s13 }
   0x6   : > { %p89_p1 = scmp.eq.s32.totalorder %s88_s20, 0  ;;  %p102_p2 = scmp.eq.s32.totalorder %s1048_s16, 3 }
   0x7   : > { %p107_p3 = scmp.ne.s32.totalorder %s986_s13, %s982_s12  ;;  %p108_p4 = scmp.eq.s32.totalorder %s843_s17, 3 }
   0x8   : > { %s1063_s21 = scalar_select %p89_p1, %s990_s14, %s91_s19  }
   0x9   : > { %p1065_p5 = por %p102_p2, %p101_p0  ;;  %p1069_p6 = por %p108_p4, %p107_p3 }
   0xa   : > { %p846_p7 = scmp.ge.s32.totalorder %s994_s15, 1  ;;  %p140_p8 = scmp.lt.s32.totalorder %s994_s15, 5 }
   0xc   : > { %p141_p9 = pnand %p846_p7, %p140_p8 }
   0xd   : > { %p164_p10 = scmp.lt.s32.totalorder (!%p141_p9), %s1048_s16, 3  ;;  %s998_s29 = smov (!%p141_p9), 126  }
   0xe   : > { %144 = sbr.rel (%p141_p9) target bundleno = 406 (0x196), region = 32  ;;  %s999_s30 = smov (!%p141_p9), 127  }
   0xf   : > { %s1000_s6 = smov (!%p141_p9), 110   ;;  %s1001_s7 = smov (!%p141_p9), 109  }
  0x10   : > { %s1002_s8 = smov (!%p141_p9), 108   ;;  %s1003_s9 = smov (!%p141_p9), 92  }
  0x11   : > { %s1004_s10 = smov (!%p141_p9), 91   ;;  %s1005_s11 = smov (!%p141_p9), 90  }
  0x12   : > { %s161_s17 = sand.u32 (!%p141_p9), 1, %s986_s13   ;;  %s880_s20 = sshll.u32 (!%p141_p9), %s1048_s16, 8 }
  0x13   : > { %v179_v0 = vlaneseq  ;;  %v996_v1 = vmov 1983009808   ;;  %s165_s24 = scalar_select %p164_p10, %s1048_s16, 3  ;;  %vm204_vm0 = vcmask 1041408   ;;  %v997_v9 = vmov 0   ;;  %v743_v14 = vld [vmem:[%s1200_s2] sm:$0xff] }
  0x14   : > { %v177_v2 = vunpack.c.l.s4 %v996_v1  ;;  %243 = vmatprep.mubr.bf16.mxu0 %v997_v9  ;;  %293 = vmatprep.mubr.bf16.mxu1 %v997_v9  ;;  %v171_v13 = vld [vmem:[%s1199_s1] sm:$0xf]  ;;  %vm200_vm1 = vcmask 31744   ;;  %v753_v15 = vsub.f32 0.0, %v743_v14  ;;  %vm197_vm2 = vcmask 1039360   ;;  %s847_s19 = sshll.u32 %s161_s17, 4 }
  0x15   : > { %v180_v3 = vshrl.u32 %v179_v0, 7  ;;  %s881_s25 = smul.u32 6, %s165_s24  ;;  %932 = vset.pattern.permute.xlu1 %v997_v9  ;;  %931 = vset.pattern.permute.xlu0 %v997_v9  ;;  %vm310_vm3 = vcmask 1031168   ;;  %v849_v25 = vld [vmem:[%s1199_s1 + $0x4] sm:$0xf]  ;;  %vm373_vm4 = vcmask 900096  }
  0x16   : > { %v178_v4 = vunpack.c.0.s8 %v177_v2  ;;  %vm436_vm5 = vcmask 891904   ;;  %v854_v36 = vld [vmem:[%s1199_s1 + $0x8] sm:$0xf]  ;;  %v857_v39 = vld [vmem:[%s1199_s1 + $0xc] sm:$0xf]  ;;  %vm499_vm6 = vcmask 883712  }
  0x17   : > { %s168_s28 = scalar_lea.vmem %s1198_s0, %s881_s25  ;;  %v860_v46 = vld [vmem:[%s1199_s1 + $0x10] sm:$0xf]  ;;  %vm562_vm7 = vcmask 752640   ;;  %v863_v51 = vld [vmem:[%s1199_s1 + $0x14] sm:$0xf]  ;;  %vm625_vm8 = vcmask 744448  }
  0x18   : > { %v181_v5 = vsub.s32 %v178_v4, %v180_v3  ;;  %v170_v6 = vld [vmem:[%s168_s28] sm:$0x3f]  ;;  %v866_v57 = vld [vmem:[%s1199_s1 + $0x18] sm:$0xf]  ;;  %vm688_vm9 = vcmask 736256   ;;  %s163_s24 = scalar_lea.vmem [#allocation2], %s847_s19  ;;  %s1155_s28 = scalar_lea.hbm %s1201_s3, %s880_s20 }
  0x19   : > { %v175_v8 = vcombine.high %v170_v6, %v170_v6  ;;  %v869_v1 = vld [vmem:[%s1199_s1 + $0x1c] sm:$0xf]  ;;  %s784_s25 = sshll.u32 %s163_s24, 4  ;;  %s770_s16 = scalar_lea.sflag [#allocation3], %s161_s17  ;;  %s1157_s25 = int_to_ptr.vmem [resolvable:$true] %s784_s25 }
  0x1a   : > { %v182_v7 = vrot.slane %v170_v6, %v181_v5 }
  0x1b   : > { %v189_v10 = vrot.slane %v175_v8, %v181_v5 }
  0x1c   : > { %304 = vrot.lane.b32.xlu1 %v182_v7, %s998_s29  ;;  %191 = vrot.lane.b32.xlu0 %v182_v7, %s999_s30  ;;  %v190_v11 = vcombine.high %v182_v7, %v182_v7  ;;  %v256_v12 = vsel %vm204_vm0, %v182_v7, 0 }
  0x1e   : > { %852 = vmatprep.subr.msk.bf16.mxu1 %vm204_vm0, %v190_v11 }
  0x1f   : > { %276 = vmatpush1.bf16.msra.mxu1 %v256_v12 }
  0x20   : > { %367 = vrot.lane.b32.xlu0 %v182_v7, %s1000_s6  ;;  %195 = vrot.lane.b32.xlu1 %v189_v10, %s999_s30 }
  0x22   : > { %853 = vmatmul.mubr.msk.bf16.vlgmr.msra.gmra.mxu1 %vm200_vm1, %v171_v13 }
  0x23   : > { %417 = vmatprep.mubr.bf16.mxu1 %v997_v9 }
  0x24   : > { %193 = vrot.lane.b32.xlu0 %v190_v11, %s999_s30  ;;  %308 = vrot.lane.b32.xlu1 %v189_v10, %s998_s29  ;;  %s1006_s30 = smov [#allocation2]  }
  0x25   : > { %s938_s4 = sshll.u32 %s1006_s30, 4  ;;  %s939_s4 = int_to_ptr.vmem [resolvable:$false] %s938_s4 }
  0x26   : > { %s940_s5 = scalar_lea.vmem %s939_s4, 512  ;;  %p941_p0 = scmp.lt.s32.totalorder %s1157_s25, %s939_s4 }
  0x28   : > { %306 = vrot.lane.b32.xlu0 %v190_v11, %s998_s29  ;;  %369 = vrot.lane.b32.xlu1 %v190_v11, %s1000_s6  ;;  %s934_s29 = scalar_lea.vmem %s1157_s25, 256 }
  0x29   : > { %p935_p11 = scmp.ne.s32.totalorder %s1157_s25, %s934_s29  ;;  %p942_p1 = scmp.lt.s32.totalorder %s940_s5, %s934_s29 }
  0x2b   : > { %p936_p12 = pnand %p935_p11, %p1065_p5  ;;  %p943_p2 = por %p942_p1, %p941_p0 }
  0x2c   : > { %371 = vrot.lane.b32.xlu0 %v189_v10, %s1000_s6  ;;  %430 = vrot.lane.b32.xlu1 %v182_v7, %s1001_s7 }
  0x2d   : > { %p937_p13 = pneg %p936_p12 }
  0x2f   : > { %p944_p3 = pnand %p943_p2, %p937_p13 }
  0x30   : > { %432 = vrot.lane.b32.xlu0 %v190_v11, %s1001_s7  ;;  %434 = vrot.lane.b32.xlu1 %v189_v10, %s1001_s7 }
  0x34   : > { %493 = vrot.lane.b32.xlu0 %v182_v7, %s1002_s8  ;;  %495 = vrot.lane.b32.xlu1 %v190_v11, %s1002_s8 }
  0x38   : > { %497 = vrot.lane.b32.xlu0 %v189_v10, %s1002_s8  ;;  %556 = vrot.lane.b32.xlu1 %v182_v7, %s1003_s9 }
  0x3c   : > { %558 = vrot.lane.b32.xlu0 %v190_v11, %s1003_s9  ;;  %560 = vrot.lane.b32.xlu1 %v189_v10, %s1003_s9 }
  0x40   : > { %619 = vrot.lane.b32.xlu0 %v182_v7, %s1004_s10  ;;  %621 = vrot.lane.b32.xlu1 %v190_v11, %s1004_s10 }
  0x44   : > { %623 = vrot.lane.b32.xlu0 %v189_v10, %s1004_s10  ;;  %682 = vrot.lane.b32.xlu1 %v182_v7, %s1005_s11  ;;  %v872_v7 = vld [vmem:[%s1199_s1 + $0x20] sm:$0xf] }
  0x48   : > { %684 = vrot.lane.b32.xlu0 %v190_v11, %s1005_s11  ;;  %686 = vrot.lane.b32.xlu1 %v189_v10, %s1005_s11 }
  0x4c   : > { %746 = vperm.xlu0 %931, %v743_v14   ;;  %756 = vperm.xlu1 %932, %v753_v15  }
  0x8e   : > { %v305_v16 = vpop.permute.xlu1 %304  ;;  %v192_v17 = vpop.permute.xlu0 %191 }
  0x92   : > { %v368_v18 = vpop.permute.xlu0 %367  ;;  %v196_v19 = vpop.permute.xlu1 %195 }
  0x96   : > { %v194_v20 = vpop.permute.xlu0 %193  ;;  %v309_v21 = vpop.permute.xlu1 %308 }
  0x97   : > { %v199_v22 = vsel %vm197_vm2, %v194_v20, %v196_v19  ;;  %v198_v23 = vsel %vm197_vm2, %v192_v17, %v194_v20 }
  0x98   : > { %850 = vmatprep.subr.msk.bf16.mxu0 %vm204_vm0, %v199_v22  ;;  %v206_v24 = vsel %vm204_vm0, %v198_v23, 0 }
  0x99   : > { %226 = vmatpush1.bf16.msra.mxu0 %v206_v24 }
  0x9a   : > { %v307_v26 = vpop.permute.xlu0 %306  ;;  %v370_v27 = vpop.permute.xlu1 %369 }
  0x9b   : > { %v311_v28 = vsel %vm310_vm3, %v305_v16, %v307_v26  ;;  %v312_v29 = vsel %vm310_vm3, %v307_v26, %v309_v21  ;;  %v374_v31 = vsel %vm373_vm4, %v368_v18, %v370_v27 }
  0x9c   : > { %v317_v30 = vsel %vm204_vm0, %v311_v28, 0  ;;  %851 = vmatmul.mubr.msk.bf16.vlgmr.msra.gmra.mxu0 %vm200_vm1, %v849_v25  ;;  %855 = vmatprep.subr.msk.bf16.mxu0 %vm204_vm0, %v312_v29  ;;  %v380_v35 = vsel %vm204_vm0, %v374_v31, 0 }
  0x9d   : > { %337 = vmatpush1.bf16.msra.mxu0 %v317_v30  ;;  %354 = vmatprep.mubr.bf16.mxu0 %v997_v9 }
  0x9e   : > { %v372_v32 = vpop.permute.xlu0 %371  ;;  %v431_v33 = vpop.permute.xlu1 %430 }
  0x9f   : > { %v375_v34 = vsel %vm373_vm4, %v370_v27, %v372_v32 }
  0xa0   : > { %858 = vmatprep.subr.msk.bf16.mxu1 %vm204_vm0, %v375_v34 }
  0xa1   : > { %400 = vmatpush1.bf16.msra.mxu1 %v380_v35 }
  0xa2   : > { %v433_v37 = vpop.permute.xlu0 %432  ;;  %v435_v38 = vpop.permute.xlu1 %434 }
  0xa3   : > { %v437_v40 = vsel %vm436_vm5, %v431_v33, %v433_v37  ;;  %v438_v41 = vsel %vm436_vm5, %v433_v37, %v435_v38 }
  0xa4   : > { %v443_v42 = vsel %vm204_vm0, %v437_v40, 0  ;;  %856 = vmatmul.mubr.msk.bf16.vlgmr.msra.gmra.mxu0 %vm200_vm1, %v854_v36  ;;  %861 = vmatprep.subr.msk.bf16.mxu0 %vm204_vm0, %v438_v41 }
  0xa5   : > { %463 = vmatpush1.bf16.msra.mxu0 %v443_v42  ;;  %859 = vmatmul.mubr.msk.bf16.vlgmr.msra.gmra.mxu1 %vm200_vm1, %v857_v39 }
  0xa6   : > { %v494_v43 = vpop.permute.xlu0 %493  ;;  %v496_v44 = vpop.permute.xlu1 %495  ;;  %480 = vmatprep.mubr.bf16.mxu0 %v997_v9  ;;  %543 = vmatprep.mubr.bf16.mxu1 %v997_v9 }
  0xa7   : > { %v500_v45 = vsel %vm499_vm6, %v494_v43, %v496_v44 }
  0xa8   : > { %v506_v50 = vsel %vm204_vm0, %v500_v45, 0 }
  0xaa   : > { %v498_v47 = vpop.permute.xlu0 %497  ;;  %v557_v48 = vpop.permute.xlu1 %556 }
  0xab   : > { %v501_v49 = vsel %vm499_vm6, %v496_v44, %v498_v47 }
  0xac   : > { %862 = vmatmul.mubr.msk.bf16.vlgmr.msra.gmra.mxu0 %vm200_vm1, %v860_v46  ;;  %864 = vmatprep.subr.msk.bf16.mxu1 %vm204_vm0, %v501_v49 }
  0xad   : > { %526 = vmatpush1.bf16.msra.mxu1 %v506_v50  ;;  %606 = vmatprep.mubr.bf16.mxu0 %v997_v9 }
  0xae   : > { %v559_v52 = vpop.permute.xlu0 %558  ;;  %v561_v53 = vpop.permute.xlu1 %560 }
  0xaf   : > { %v563_v54 = vsel %vm562_vm7, %v557_v48, %v559_v52  ;;  %v564_v55 = vsel %vm562_vm7, %v559_v52, %v561_v53 }
  0xb0   : > { %v569_v56 = vsel %vm204_vm0, %v563_v54, 0  ;;  %865 = vmatmul.mubr.msk.bf16.vlgmr.msra.gmra.mxu1 %vm200_vm1, %v863_v51  ;;  %867 = vmatprep.subr.msk.bf16.mxu0 %vm204_vm0, %v564_v55 }
  0xb1   : > { %589 = vmatpush1.bf16.msra.mxu0 %v569_v56  ;;  %669 = vmatprep.mubr.bf16.mxu1 %v997_v9 }
  0xb2   : > { %v620_v58 = vpop.permute.xlu0 %619  ;;  %v622_v59 = vpop.permute.xlu1 %621 }
  0xb3   : > { %v626_v60 = vsel %vm625_vm8, %v620_v58, %v622_v59 }
  0xb4   : > { %868 = vmatmul.mubr.msk.bf16.vlgmr.msra.gmra.mxu0 %vm200_vm1, %v866_v57  ;;  %v632_v0 = vsel %vm204_vm0, %v626_v60, 0 }
  0xb5   : > { %732 = vmatprep.mubr.bf16.mxu0 %v997_v9 }
  0xb6   : > { %v624_v61 = vpop.permute.xlu0 %623  ;;  %v683_v62 = vpop.permute.xlu1 %682 }
  0xb7   : > { %v627_v63 = vsel %vm625_vm8, %v622_v59, %v624_v61 }
  0xb8   : > { %870 = vmatprep.subr.msk.bf16.mxu1 %vm204_vm0, %v627_v63 }
  0xb9   : > { %652 = vmatpush1.bf16.msra.mxu1 %v632_v0 }
  0xba   : > { %v685_v2 = vpop.permute.xlu0 %684  ;;  %v687_v3 = vpop.permute.xlu1 %686 }
  0xbb   : > { %v689_v4 = vsel %vm688_vm9, %v683_v62, %v685_v2  ;;  %v690_v5 = vsel %vm688_vm9, %v685_v2, %v687_v3 }
  0xbc   : > { %v695_v6 = vsel %vm204_vm0, %v689_v4, 0  ;;  %871 = vmatmul.mubr.msk.bf16.vlgmr.msra.gmra.mxu1 %vm200_vm1, %v869_v1  ;;  %873 = vmatprep.subr.msk.bf16.mxu0 %vm204_vm0, %v690_v5 }
  0xbd   : > { %715 = vmatpush1.bf16.msra.mxu0 %v695_v6 }
  0xc0   : > { %874 = vmatmul.mubr.msk.bf16.vlgmr.msra.gmra.mxu0 %vm200_vm1, %v872_v7 }
  0xc7   : > { %v747_v51 = vpop.permute.xlu0 %746  ;;  %v757_v56 = vpop.permute.xlu1 %756 }
  0xe2   : > { %v295_v8 = vpop.f32.mrf.mxu1 }
  0xe4   : > { %v297_v9 = vpop.f32.mrf.mxu1 }
  0xe6   : > { %v299_v10 = vpop.f32.mrf.mxu1 }
  0xe8   : > { %v300_v11 = vpop.f32.mrf.mxu1 }
 0x15c   : > { %v245_v12 = vpop.f32.mrf.mxu0 }
 0x15d   : > { %v296_v28 = vadd.f32 %v295_v8, %v245_v12 }
 0x15e   : > { %v247_v13 = vpop.f32.mrf.mxu0 }
 0x15f   : > { %v298_v31 = vadd.f32 %v297_v9, %v247_v13 }
 0x160   : > { %v249_v14 = vpop.f32.mrf.mxu0 }
 0x162   : > { %v250_v15 = vpop.f32.mrf.mxu0 }
 0x164   : > { %v356_v16 = vpop.f32.mrf.mxu0 }
 0x165   : > { %v419_v17 = vpop.f32.mrf.mxu1  ;;  %v363_v32 = vadd.f32 %v356_v16, %v296_v28 }
 0x166   : > { %v358_v18 = vpop.f32.mrf.mxu0 }
 0x167   : > { %v421_v19 = vpop.f32.mrf.mxu1  ;;  %v364_v35 = vadd.f32 %v358_v18, %v298_v31  ;;  %v426_v38 = vadd.f32 %v419_v17, %v363_v32 }
 0x168   : > { %v360_v20 = vpop.f32.mrf.mxu0 }
 0x169   : > { %v423_v21 = vpop.f32.mrf.mxu1  ;;  %v427_v40 = vadd.f32 %v421_v19, %v364_v35 }
 0x16a   : > { %v361_v22 = vpop.f32.mrf.mxu0 }
 0x16b   : > { %v424_v23 = vpop.f32.mrf.mxu1 }
 0x16c   : > { %v482_v24 = vpop.f32.mrf.mxu0 }
 0x16d   : > { %v489_v41 = vadd.f32 %v482_v24, %v426_v38 }
 0x16e   : > { %v484_v25 = vpop.f32.mrf.mxu0 }
 0x16f   : > { %v490_v43 = vadd.f32 %v484_v25, %v427_v40 }
 0x170   : > { %v486_v26 = vpop.f32.mrf.mxu0  ;;  %v545_v27 = vpop.f32.mrf.mxu1 }
 0x171   : > { %v552_v44 = vadd.f32 %v545_v27, %v489_v41 }
 0x172   : > { %v487_v29 = vpop.f32.mrf.mxu0  ;;  %v547_v30 = vpop.f32.mrf.mxu1 }
 0x173   : > { %v553_v46 = vadd.f32 %v547_v30, %v490_v43 }
 0x174   : > { %v608_v33 = vpop.f32.mrf.mxu0  ;;  %v549_v34 = vpop.f32.mrf.mxu1 }
 0x175   : > { %v615_v47 = vadd.f32 %v608_v33, %v552_v44 }
 0x176   : > { %v610_v36 = vpop.f32.mrf.mxu0  ;;  %v550_v37 = vpop.f32.mrf.mxu1 }
 0x177   : > { %v616_v49 = vadd.f32 %v610_v36, %v553_v46 }
 0x178   : > { %v612_v39 = vpop.f32.mrf.mxu0 }
 0x17a   : > { %v613_v42 = vpop.f32.mrf.mxu0 }
 0x17c   : > { %v671_v45 = vpop.f32.mrf.mxu1 }
 0x17d   : > { %v678_v50 = vadd.f32 %v671_v45, %v615_v47 }
 0x17e   : > { %v673_v48 = vpop.f32.mrf.mxu1 }
 0x17f   : > { %v679_v54 = vadd.f32 %v673_v48, %v616_v49 }
 0x180   : > { %v734_v52 = vpop.f32.mrf.mxu0  ;;  %v675_v53 = vpop.f32.mrf.mxu1 }
 0x181   : > { %v741_v55 = vadd.f32 %v734_v52, %v678_v50 }
 0x182   : > { %v736_v57 = vpop.f32.mrf.mxu0  ;;  %v676_v58 = vpop.f32.mrf.mxu1 }
 0x183   : > { %v742_v59 = vadd.f32 %v736_v57, %v679_v54  ;;  %v751_v60 = vsub.f32 %v741_v55, %v747_v51  ;;  %v761_v61 = vadd.f32 %v747_v51, %v741_v55  ;;  %vm759_vm10 = vcmp.lt.f32.partialorder %v741_v55, %v757_v56 }
 0x184   : > { %v738_v62 = vpop.f32.mrf.mxu0  ;;  %vm749_vm12 = vcmp.gt.f32.partialorder %v741_v55, %v747_v51 }
 0x185   : > { %v752_v63 = vsub.f32 %v742_v59, %v747_v51  ;;  %v762_v0 = vadd.f32 %v747_v51, %v742_v59  ;;  %vm760_vm11 = vcmp.lt.f32.partialorder %v742_v59, %v757_v56  ;;  %v763_v1 = vsel %vm759_vm10, %v761_v61, 0.0 }
 0x186   : > { %v739_v2 = vpop.f32.mrf.mxu0  ;;  %vm750_vm13 = vcmp.gt.f32.partialorder %v742_v59, %v747_v51  ;;  %v765_v4 = vsel %vm749_vm12, %v751_v60, %v763_v1 }
 0x187   : > { %v764_v3 = vsel %vm760_vm11, %v762_v0, 0.0  ;;  %767 = vst [vmem:[%s163_s24] sm:$0xff] %v765_v4 }
 0x188   : > { %v766_v5 = vsel %vm750_vm13, %v752_v63, %v764_v3 }
 0x189   : > { %768 = vst [vmem:[%s163_s24 + $0x8] sm:$0xff] %v766_v5 }
 0x18a   : > { %947 = shalt.err (!%p944_p3)
}
 0x18b   : > { %s948_s6 = scalar_lea.hbm %s1155_s28, 256  ;;  %s952_s9 = scalar_lea.hbm %s1201_s3, 1024 }
 0x18c   : > { %p949_p4 = scmp.ne.s32.totalorder %s1155_s28, %s948_s6  ;;  %p953_p9 = scmp.lt.s32.totalorder %s1155_s28, %s1201_s3 }
 0x18d   : > { %p954_p10 = scmp.lt.s32.totalorder %s952_s9, %s948_s6 }
 0x18e   : > { %p950_p7 = pnand %p949_p4, %p1065_p5 }
 0x18f   : > { %p955_p11 = por %p954_p10, %p953_p9 }
 0x190   : > { %p951_p8 = pneg %p950_p7 }
 0x192   : > { %p956_p12 = pnand %p955_p11, %p951_p8 }
 0x194   : > { %959 = shalt.err (!%p956_p12)
}
 0x195   : > { %882 = dma.vmem_to_hbm [thread:$0]  (%p1065_p5), %s1157_s25, 256, %s1155_s28, %s770_s16  }
 0x196 PF: > { %p888_p13 = scmp.ge.s32.totalorder %s994_s15, 2  ;;  %s796_s17 = sand.u32 1, %s982_s12  }
 0x197   : > { %s797_s19 = scalar_lea.sflag [#allocation3], %s796_s17 }
 0x198   : > { %p885_p0 = pnand %p888_p13, %p1069_p6 }
 0x19a   : > { %p886_p1 = pneg %p885_p0 }
 0x19c   : > { %977 = dma.done.wait (%p886_p1), %s797_s19, 256  }
 0x19d   : > { %979 = vsyncadd (%p886_p1), %s797_s19, 4294967040  ;;  %p13_p2 = scmp.ge.s32.totalorder %s1052_s18, 6   ;;  %s1204_s12 = smov %s986_s13 }
 0x19e   : > { %s1205_s13 = smov %s990_s14  ;;  %s1206_s14 = smov %s1063_s21 }
 0x19f   : > { %s1207_s15 = smov %s1052_s18  ;;  %15 = sbr.rel (!%p13_p2) target bundleno = 3 (0x3), region = 75 }
 0x1a4   :  { %802 = vsyncpa [#allocation3], 1 }
 0x1a5   :  { %804 = vsyncpa [#allocation3 + $0x1], 1 }

</bundles_post_ra>
